<compile_context>
chip_gen: v7x
topology: tpu7x:2x2x1
jax: 0.10.0
libtpu: 0.0.40
codegen_flags: <defaults>
</compile_context>

<pallas_src>
import functools

import jax
import jax.numpy as jnp
from jax.experimental import pallas as pl
from jax.experimental.pallas import tpu as pltpu


def _round_up(x, m):
    return ((x + m - 1) // m) * m


def _pad2(a, rows, cols):
    return jnp.pad(a, ((0, rows - a.shape[0]), (0, cols - a.shape[1])))


def _mlp_kernel(x_ref, w1_ref, b1_ref, w2_ref, b2_ref, w3_ref, b3_ref, out_ref):
    # fc1 + relu  (MXU matmul in weight dtype, f32 accumulation)
    x = x_ref[...]
    h1 = jnp.dot(x.astype(w1_ref.dtype), w1_ref[...],
                 preferred_element_type=jnp.float32)
    h1 = jnp.maximum(h1 + b1_ref[...], 0.0)
    # fc2 + relu
    h2 = jnp.dot(h1.astype(w2_ref.dtype), w2_ref[...],
                 preferred_element_type=jnp.float32)
    h2 = jnp.maximum(h2 + b2_ref[...], 0.0)
    # fc3 + tanh (narrow 8-lane output; tanh rides the EUP slot)
    h3 = jnp.dot(h2.astype(w3_ref.dtype), w3_ref[...],
                 preferred_element_type=jnp.float32)
    out_ref[...] = jnp.tanh(h3 + b3_ref[...]).astype(out_ref.dtype)


@functools.partial(jax.jit,
                   static_argnames=("compute_dtype", "out_dtype", "tile_b"))
def compensator_forward(state, w1, b1, w2, b2, w3, b3, *,
                        compute_dtype=jnp.bfloat16,
                        out_dtype=jnp.float32,
                        tile_b=2048):
    """Pallas forward pass of CompensatorModel.

    state: [B, state_dim] (f32 or bf16)
    w1: [state_dim, hidden1], b1: [1, hidden1]
    w2: [hidden1, hidden2],   b2: [1, hidden2]
    w3: [hidden2, action_dim],b3: [1, action_dim]
    returns action: [B, action_dim] in out_dtype
    """
    B, S = state.shape
    H1 = w1.shape[1]
    H2 = w2.shape[1]
    A = w3.shape[1]

    # Hidden dims lane-dense (128); action dim only sublane-aligned (8).
    H1P = _round_up(H1, 128)
    H2P = _round_up(H2, 128)
    AP = _round_up(A, 8)

    # Balanced batch tiling.  Force >= 2 grid steps for non-tiny batches so the
    # "parallel" batch axis can be sharded across both TensorCores on v7x.
    n = pl.cdiv(B, tile_b)
    if B >= 256 and n < 2:
        n = 2
    tb = _round_up(pl.cdiv(B, n), 8)
    BP = n * tb
    grid = (n,)

    xs = state
    if BP != B:
        xs = jnp.pad(xs, ((0, BP - B), (0, 0)))

    # Zero-pad weights/biases; zeros are preserved by relu/tanh so padded output
    # columns stay zero and are sliced away below.
    w1p = _pad2(w1, S, H1P).astype(compute_dtype)
    w2p = _pad2(w2, H1P, H2P).astype(compute_dtype)
    w3p = _pad2(w3, H2P, AP).astype(compute_dtype)
    b1p = _pad2(b1, 1, H1P).astype(jnp.float32)
    b2p = _pad2(b2, 1, H2P).astype(jnp.float32)
    b3p = _pad2(b3, 1, AP).astype(jnp.float32)

    wbytes = jnp.dtype(compute_dtype).itemsize
    xbytes = jnp.dtype(xs.dtype).itemsize
    obytes = jnp.dtype(out_dtype).itemsize
    cost = pl.CostEstimate(
        flops=2 * BP * (S * H1P + H1P * H2P + H2P * AP),
        transcendentals=BP * AP,
        bytes_accessed=(BP * S * xbytes
                        + (S * H1P + H1P * H2P + H2P * AP) * wbytes
                        + (H1P + H2P + AP) * 4
                        + BP * AP * obytes),
    )

    out = pl.pallas_call(
        _mlp_kernel,
        out_shape=jax.ShapeDtypeStruct((BP, AP), out_dtype),
        grid=grid,
        in_specs=[
            pl.BlockSpec((tb, S), lambda i: (i, 0)),       # state tile (pipelined)
            pl.BlockSpec((S, H1P), lambda i: (0, 0)),      # weights: VMEM-resident
            pl.BlockSpec((1, H1P), lambda i: (0, 0)),
            pl.BlockSpec((H1P, H2P), lambda i: (0, 0)),
            pl.BlockSpec((1, H2P), lambda i: (0, 0)),
            pl.BlockSpec((H2P, AP), lambda i: (0, 0)),
            pl.BlockSpec((1, AP), lambda i: (0, 0)),
        ],
        out_specs=pl.BlockSpec((tb, AP), lambda i: (i, 0)),  # narrow 8-lane output tile
        compiler_params=pltpu.CompilerParams(
            dimension_semantics=("parallel",),
            vmem_limit_bytes=32 * 1024 * 1024,
        ),
        cost_estimate=cost,
    )(xs, w1p, b1p, w2p, b2p, w3p, b3p)

    return out[:B, :A]


def init_compensator_params(key, state_dim, action_dim, hidden1=30, hidden2=20,
                            init_w=0.003):
    """Deterministic init mirroring the PyTorch module's init scheme.

    PyTorch fc weight shape is (out, in); fanin_init uses fanin = size[0] = out
    (a quirk of the original code), i.e. bound = 1/sqrt(out_features).
    Biases keep nn.Linear default init: U(-1/sqrt(in_features), 1/sqrt(in_features))
    (the module's init_weights never touches biases, including fc3.bias).
    Weights are returned already transposed to (in, out) for the kernel.
    """
    k1, k2, k3, kb1, kb2, kb3 = jax.random.split(key, 6)

    def uni(k, shape, bound):
        return jax.random.uniform(k, shape, jnp.float32, -bound, bound)

    # fc1: weight (hidden1, state_dim) -> fanin = hidden1
    w1 = uni(k1, (hidden1, state_dim), 1.0 / jnp.sqrt(hidden1)).T
    b1 = uni(kb1, (1, hidden1), 1.0 / jnp.sqrt(state_dim))
    # fc2: weight (hidden2, hidden1) -> fanin = hidden2
    w2 = uni(k2, (hidden2, hidden1), 1.0 / jnp.sqrt(hidden2)).T
    b2 = uni(kb2, (1, hidden2), 1.0 / jnp.sqrt(hidden1))
    # fc3: weight (action_dim, hidden2) uniform(-init_w, init_w)
    w3 = uni(k3, (action_dim, hidden2), init_w).T
    b3 = uni(kb3, (1, action_dim), 1.0 / jnp.sqrt(hidden2))
    return w1, b1, w2, b2, w3, b3


def reference_forward(state, w1, b1, w2, b2, w3, b3):
    h1 = jnp.maximum(state @ w1 + b1, 0.0)
    h2 = jnp.maximum(h1 @ w2 + b2, 0.0)
    return jnp.tanh(h2 @ w3 + b3)


if __name__ == "__main__":
    key = jax.random.PRNGKey(0)
    k_params, k_state, k_state_big = jax.random.split(key, 3)

    batch = 8
    state_dim = 16
    action_dim = 4
    hidden1 = 30
    hidden2 = 20

    params = init_compensator_params(k_params, state_dim, action_dim,
                                     hidden1=hidden1, hidden2=hidden2)
    state = jax.random.normal(k_state, (batch, state_dim), dtype=jnp.float32)
    ref = reference_forward(state, *params)

    # Exact (f32 compute) path — tight tolerance.
    act_f32 = jax.block_until_ready(
        compensator_forward(state, *params, compute_dtype=jnp.float32))
    assert act_f32.shape == (batch, action_dim)
    assert jnp.allclose(act_f32, ref, atol=1e-5, rtol=1e-5)

    # Default bf16-weight path (MXU-native) — f32 accumulation, looser tolerance.
    # Note: the input and intermediate activations are cast to bf16 for the matmuls
    # on this path, not just the weights.
    act_bf16 = jax.block_until_ready(compensator_forward(state, *params))
    assert act_bf16.shape == (batch, action_dim)
    assert jnp.allclose(act_bf16, ref, atol=2e-2, rtol=2e-2)

    # Multi-tile, balanced batch grid (600 rows -> 3 tiles of 200; forced >= 2 steps).
    state_big = jax.random.normal(k_state_big, (600, state_dim), dtype=jnp.float32)
    act_big = jax.block_until_ready(
        compensator_forward(state_big, *params, compute_dtype=jnp.float32, tile_b=256))
    ref_big = reference_forward(state_big, *params)
    assert act_big.shape == (600, action_dim)
    assert jnp.allclose(act_big, ref_big, atol=1e-5, rtol=1e-5)

    # bf16-output path (optional, halves output writeback).
    act_bf16_out = jax.block_until_ready(
        compensator_forward(state_big, *params, out_dtype=jnp.bfloat16))
    assert act_bf16_out.shape == (600, action_dim)
    assert act_bf16_out.dtype == jnp.bfloat16
    assert jnp.allclose(act_bf16_out.astype(jnp.float32), ref_big, atol=3e-2, rtol=3e-2)

    print("KERNEL_OK")
</pallas_src>

<mosaic_0001>
module attributes {stable_mosaic.version = 11 : i64} {
  func.func @_mlp_kernel(%arg0: i32, %arg1: memref<8x16xf32, #tpu.memory_space<vmem>>, %arg2: memref<16x128xf32, #tpu.memory_space<vmem>>, %arg3: memref<1x128xf32, #tpu.memory_space<vmem>>, %arg4: memref<128x128xf32, #tpu.memory_space<vmem>>, %arg5: memref<1x128xf32, #tpu.memory_space<vmem>>, %arg6: memref<128x8xf32, #tpu.memory_space<vmem>>, %arg7: memref<1x8xf32, #tpu.memory_space<vmem>>, %arg8: memref<8x8xf32, #tpu.memory_space<vmem>>) attributes {dimension_semantics = [#tpu.dimension_semantics<parallel>], iteration_bounds = array<i64: 1>, scalar_prefetch = 0 : i64, scratch_operands = 0 : i64, tpu.core_type = #tpu.core_type<tc>, window_params = [{transform_indices = @transform_0, window_bounds = array<i64: 8, 16>}, {pipeline_mode = #tpu.pipeline_mode<synchronous>, transform_indices = @transform_1, window_bounds = array<i64: 16, 128>}, {pipeline_mode = #tpu.pipeline_mode<synchronous>, transform_indices = @transform_2, window_bounds = array<i64: 1, 128>}, {pipeline_mode = #tpu.pipeline_mode<synchronous>, transform_indices = @transform_3, window_bounds = array<i64: 128, 128>}, {pipeline_mode = #tpu.pipeline_mode<synchronous>, transform_indices = @transform_4, window_bounds = array<i64: 1, 128>}, {pipeline_mode = #tpu.pipeline_mode<synchronous>, transform_indices = @transform_5, window_bounds = array<i64: 128, 8>}, {pipeline_mode = #tpu.pipeline_mode<synchronous>, transform_indices = @transform_6, window_bounds = array<i64: 1, 8>}, {transform_indices = @transform_7, window_bounds = array<i64: 8, 8>}]} {
    %c0 = arith.constant 0 : index
    %c0_0 = arith.constant 0 : index
    %0 = vector.load %arg1[%c0, %c0_0] : memref<8x16xf32, #tpu.memory_space<vmem>>, vector<8x16xf32>
    %c0_1 = arith.constant 0 : index
    %c0_2 = arith.constant 0 : index
    %1 = vector.load %arg2[%c0_1, %c0_2] : memref<16x128xf32, #tpu.memory_space<vmem>>, vector<16x128xf32>
    %cst = arith.constant dense<0.000000e+00> : vector<8x128xf32>
    %2 = tpu.matmul %0, %1, %cst {dimension_numbers = #tpu.dot_dimension_numbers<[1], [0], [0], [1], [0, 0, 1, 1], [], []>} : vector<8x16xf32>, vector<16x128xf32>, vector<8x128xf32> -> vector<8x128xf32>
    %c0_3 = arith.constant 0 : index
    %c0_4 = arith.constant 0 : index
    %3 = vector.load %arg3[%c0_3, %c0_4] : memref<1x128xf32, #tpu.memory_space<vmem>>, vector<1x128xf32>
    %4 = vector.broadcast %3 : vector<1x128xf32> to vector<8x128xf32>
    %5 = arith.addf %2, %4 : vector<8x128xf32>
    %cst_5 = arith.constant 0.000000e+00 : f32
    %6 = vector.broadcast %cst_5 : f32 to vector<8x128xf32>
    %7 = arith.maximumf %5, %6 : vector<8x128xf32>
    %c0_6 = arith.constant 0 : index
    %c0_7 = arith.constant 0 : index
    %8 = vector.load %arg4[%c0_6, %c0_7] : memref<128x128xf32, #tpu.memory_space<vmem>>, vector<128x128xf32>
    %cst_8 = arith.constant dense<0.000000e+00> : vector<8x128xf32>
    %9 = tpu.matmul %7, %8, %cst_8 {dimension_numbers = #tpu.dot_dimension_numbers<[1], [0], [0], [1], [0, 0, 1, 1], [], []>} : vector<8x128xf32>, vector<128x128xf32>, vector<8x128xf32> -> vector<8x128xf32>
    %c0_9 = arith.constant 0 : index
    %c0_10 = arith.constant 0 : index
    %10 = vector.load %arg5[%c0_9, %c0_10] : memref<1x128xf32, #tpu.memory_space<vmem>>, vector<1x128xf32>
    %11 = vector.broadcast %10 : vector<1x128xf32> to vector<8x128xf32>
    %12 = arith.addf %9, %11 : vector<8x128xf32>
    %cst_11 = arith.constant 0.000000e+00 : f32
    %13 = vector.broadcast %cst_11 : f32 to vector<8x128xf32>
    %14 = arith.maximumf %12, %13 : vector<8x128xf32>
    %c0_12 = arith.constant 0 : index
    %c0_13 = arith.constant 0 : index
    %15 = vector.load %arg6[%c0_12, %c0_13] : memref<128x8xf32, #tpu.memory_space<vmem>>, vector<128x8xf32>
    %cst_14 = arith.constant dense<0.000000e+00> : vector<8x8xf32>
    %16 = tpu.matmul %14, %15, %cst_14 {dimension_numbers = #tpu.dot_dimension_numbers<[1], [0], [0], [1], [0, 0, 1, 1], [], []>} : vector<8x128xf32>, vector<128x8xf32>, vector<8x8xf32> -> vector<8x8xf32>
    %c0_15 = arith.constant 0 : index
    %c0_16 = arith.constant 0 : index
    %17 = vector.load %arg7[%c0_15, %c0_16] : memref<1x8xf32, #tpu.memory_space<vmem>>, vector<1x8xf32>
    %18 = vector.broadcast %17 : vector<1x8xf32> to vector<8x8xf32>
    %19 = arith.addf %16, %18 : vector<8x8xf32>
    %20 = math.tanh %19 : vector<8x8xf32>
    %c0_17 = arith.constant 0 : index
    %c0_18 = arith.constant 0 : index
    %21 = vector.load %arg8[%c0_17, %c0_18] : memref<8x8xf32, #tpu.memory_space<vmem>>, vector<8x8xf32>
    tpu.vector_store %arg8[%c0_17, %c0_18], %20 {strides = array<i32>} : memref<8x8xf32, #tpu.memory_space<vmem>>, vector<8x8xf32>,
    return
  }
  func.func @transform_0(%arg0: i32) -> (i32, i32) {
    %c0_i32 = arith.constant 0 : i32
    %c0_i32_0 = arith.constant 0 : i32
    return %arg0, %c0_i32 : i32, i32
  }
  func.func @transform_1(%arg0: i32) -> (i32, i32) {
    %c0_i32 = arith.constant 0 : i32
    %c0_i32_0 = arith.constant 0 : i32
    %c0_i32_1 = arith.constant 0 : i32
    return %c0_i32, %c0_i32_0 : i32, i32
  }
  func.func @transform_2(%arg0: i32) -> (i32, i32) {
    %c0_i32 = arith.constant 0 : i32
    %c0_i32_0 = arith.constant 0 : i32
    %c0_i32_1 = arith.constant 0 : i32
    return %c0_i32, %c0_i32_0 : i32, i32
  }
  func.func @transform_3(%arg0: i32) -> (i32, i32) {
    %c0_i32 = arith.constant 0 : i32
    %c0_i32_0 = arith.constant 0 : i32
    %c0_i32_1 = arith.constant 0 : i32
    return %c0_i32, %c0_i32_0 : i32, i32
  }
  func.func @transform_4(%arg0: i32) -> (i32, i32) {
    %c0_i32 = arith.constant 0 : i32
    %c0_i32_0 = arith.constant 0 : i32
    %c0_i32_1 = arith.constant 0 : i32
    return %c0_i32, %c0_i32_0 : i32, i32
  }
  func.func @transform_5(%arg0: i32) -> (i32, i32) {
    %c0_i32 = arith.constant 0 : i32
    %c0_i32_0 = arith.constant 0 : i32
    %c0_i32_1 = arith.constant 0 : i32
    return %c0_i32, %c0_i32_0 : i32, i32
  }
  func.func @transform_6(%arg0: i32) -> (i32, i32) {
    %c0_i32 = arith.constant 0 : i32
    %c0_i32_0 = arith.constant 0 : i32
    %c0_i32_1 = arith.constant 0 : i32
    return %c0_i32, %c0_i32_0 : i32, i32
  }
  func.func @transform_7(%arg0: i32) -> (i32, i32) {
    %c0_i32 = arith.constant 0 : i32
    %c0_i32_0 = arith.constant 0 : i32
    return %arg0, %c0_i32 : i32, i32
  }
}

</mosaic_0001>

<bundles_post_ra>
// kernel: compensator_forward.1
= control target key start
LH: loop header
LB: loop body
LE: loop exit
PB: predicated region body
PF: predicated region fallthrough
CT: control target
= control target key end

     0   :  { %v479_v0 = vmov 0.0|0.0   ;;  %vm480_vm0 = vmmov 0   ;;  %v481_v3 = vmov 0.0   ;;  %vm36_vm1 = vcmask 130048   ;;  %s659_s1 = inlined_call_operand.vmem [shape: f32[16,128], index: 1, kind: input, shape index: {}]   ;;  %s660_s3 = inlined_call_operand.vmem [shape: f32[128,128], index: 3, kind: input, shape index: {}]   ;;  %s661_s0 = inlined_call_operand.vmem [shape: f32[8,16], index: 0, kind: input, shape index: {}]   ;;  %s662_s5 = inlined_call_operand.vmem [shape: f32[128,8], index: 5, kind: input, shape index: {}]   ;;  %s663_s2 = inlined_call_operand.vmem [shape: f32[1,128], index: 2, kind: input, shape index: {}]   ;;  %s664_s4 = inlined_call_operand.vmem [shape: f32[1,128], index: 4, kind: input, shape index: {}]   ;;  %s665_s6 = inlined_call_operand.vmem [shape: f32[1,8], index: 6, kind: input, shape index: {}]   ;;  %s666_s7 = inlined_call_operand.vmem [shape: f32[8,8], index: 7, kind: output, shape index: {}]  }
   0x1   :  { %423 = vmatprep.subr.bf16.mxu0 %v479_v0  ;;  %v27_v1 = vld [vmem:[%s659_s1] sm:$0xff]  ;;  %v28_v2 = vld [vmem:[%s659_s1 + $0x8] sm:$0xff]  ;;  %350 = vmatprep.mubr.msk.f32.mxu0 %vm480_vm0, %v481_v3  ;;  %v113_v7 = vld [vmem:[%s660_s3 + $0x10] sm:$0xff]  ;;  %vm299_vm2 = vcmask 64512  }
   0x2   :  { %v424_v4 = vpack.c.bf16 %v28_v2, %v27_v1  ;;  %426 = vmatprep.subr.bf16.mxu1 %v479_v0  ;;  %v111_v5 = vld [vmem:[%s660_s3] sm:$0xff]  ;;  %v112_v6 = vld [vmem:[%s660_s3 + $0x8] sm:$0xff]  ;;  %385 = vmatprep.mubr.msk.f32.mxu1 %vm480_vm0, %v481_v3  ;;  %v114_v9 = vld [vmem:[%s660_s3 + $0x18] sm:$0xff] }
   0x3   :  { %v427_v8 = vpack.c.bf16 %v112_v6, %v111_v5  ;;  %v26_v10 = vld [vmem:[%s661_s0] sm:$0xff]  ;;  %v430_v11 = vpack.c.bf16 %v114_v9, %v113_v7  ;;  %v116_v13 = vld [vmem:[%s660_s3 + $0x28] sm:$0xff]  ;;  %v117_v15 = vld [vmem:[%s660_s3 + $0x30] sm:$0xff] }
   0x4   :  { %425 = vmatpush3.bf16.msra.mxu0 %v424_v4  ;;  %v115_v12 = vld [vmem:[%s660_s3 + $0x20] sm:$0xff]  ;;  %v118_v16 = vld [vmem:[%s660_s3 + $0x38] sm:$0xff]  ;;  %v120_v19 = vld [vmem:[%s660_s3 + $0x48] sm:$0xff] }
   0x5   :  { %428 = vmatpush3.bf16.msra.mxu1 %v427_v8  ;;  %450 = vmatprep.subr.bf16.mxu0 %v479_v0  ;;  %v433_v14 = vpack.c.bf16 %v116_v13, %v115_v12  ;;  %v436_v17 = vpack.c.bf16 %v118_v16, %v117_v15  ;;  %v119_v18 = vld [vmem:[%s660_s3 + $0x40] sm:$0xff]  ;;  %v121_v21 = vld [vmem:[%s660_s3 + $0x50] sm:$0xff]  ;;  %v122_v22 = vld [vmem:[%s660_s3 + $0x58] sm:$0xff] }
   0x6   :  { %429 = vmatprep.subr.bf16.mxu1 %v479_v0  ;;  %v439_v20 = vpack.c.bf16 %v120_v19, %v119_v18  ;;  %v442_v23 = vpack.c.bf16 %v122_v22, %v121_v21  ;;  %v123_v24 = vld [vmem:[%s660_s3 + $0x60] sm:$0xff]  ;;  %v124_v25 = vld [vmem:[%s660_s3 + $0x68] sm:$0xff]  ;;  %v125_v27 = vld [vmem:[%s660_s3 + $0x70] sm:$0xff] }
   0x7   :  { %351 = vmatmul.mubr.msk.f32.vlgmr.msra.gmra.mrb[0].mxu0 %vm36_vm1, %v26_v10  ;;  %v445_v26 = vpack.c.bf16 %v124_v25, %v123_v24  ;;  %v126_v28 = vld [vmem:[%s660_s3 + $0x78] sm:$0xff]  ;;  %v205_v30 = vld [vmem:[%s662_s5] sm:$0xff]  ;;  %v206_v31 = vld [vmem:[%s662_s5 + $0x8] sm:$0xff] }
   0x8   :  { %420 = vmatprep.mubr.msk.f32.mxu0 %vm480_vm0, %v481_v3  ;;  %v448_v29 = vpack.c.bf16 %v126_v28, %v125_v27  ;;  %v207_v32 = vld [vmem:[%s662_s5 + $0x10] sm:$0xff]  ;;  %v451_v33 = vpack.c.bf16 %v206_v31, %v205_v30  ;;  %v208_v34 = vld [vmem:[%s662_s5 + $0x18] sm:$0xff]  ;;  %v209_v36 = vld [vmem:[%s662_s5 + $0x20] sm:$0xff] }
   0x9   :  { %431 = vmatpush3.bf16.msra.mxu1 %v430_v11  ;;  %v454_v35 = vpack.c.bf16 %v208_v34, %v207_v32  ;;  %v210_v37 = vld [vmem:[%s662_s5 + $0x28] sm:$0xff]  ;;  %v211_v39 = vld [vmem:[%s662_s5 + $0x30] sm:$0xff]  ;;  %v212_v40 = vld [vmem:[%s662_s5 + $0x38] sm:$0xff] }
   0xa   :  { %432 = vmatprep.subr.bf16.mxu1 %v479_v0  ;;  %452 = vmatpush3.bf16.msra.mxu0 %v451_v33  ;;  %v457_v38 = vpack.c.bf16 %v210_v37, %v209_v36  ;;  %v460_v41 = vpack.c.bf16 %v212_v40, %v211_v39  ;;  %v213_v42 = vld [vmem:[%s662_s5 + $0x40] sm:$0xff]  ;;  %v214_v43 = vld [vmem:[%s662_s5 + $0x48] sm:$0xff]  ;;  %v215_v45 = vld [vmem:[%s662_s5 + $0x50] sm:$0xff] }
   0xb   :  { %453 = vmatprep.subr.bf16.mxu0 %v479_v0  ;;  %v463_v44 = vpack.c.bf16 %v214_v43, %v213_v42  ;;  %v216_v46 = vld [vmem:[%s662_s5 + $0x58] sm:$0xff]  ;;  %v217_v48 = vld [vmem:[%s662_s5 + $0x60] sm:$0xff]  ;;  %v218_v49 = vld [vmem:[%s662_s5 + $0x68] sm:$0xff] }
   0xc   :  { %v466_v47 = vpack.c.bf16 %v216_v46, %v215_v45  ;;  %v469_v50 = vpack.c.bf16 %v218_v49, %v217_v48  ;;  %v305_v51 = vld [vmem:[%s663_s2] ss:$0 sm:$0xff]  ;;  %v219_v56 = vld [vmem:[%s662_s5 + $0x70] sm:$0xff]  ;;  %v220_v57 = vld [vmem:[%s662_s5 + $0x78] sm:$0xff] }
   0xd   :  { %434 = vmatpush3.bf16.msra.mxu1 %v433_v14  ;;  %v472_v58 = vpack.c.bf16 %v220_v57, %v219_v56  ;;  %v307_v59 = vld [vmem:[%s664_s4] ss:$0 sm:$0xff] }
   0xe   :  { %435 = vmatprep.subr.bf16.mxu1 %v479_v0  ;;  %455 = vmatpush3.bf16.msra.mxu0 %v454_v35 }
   0xf   :  { %456 = vmatprep.subr.bf16.mxu0 %v479_v0 }
  0x11   :  { %437 = vmatpush3.bf16.msra.mxu1 %v436_v17 }
  0x12   :  { %438 = vmatprep.subr.bf16.mxu1 %v479_v0  ;;  %458 = vmatpush3.bf16.msra.mxu0 %v457_v38 }
  0x13   :  { %459 = vmatprep.subr.bf16.mxu0 %v479_v0 }
  0x15   :  { %440 = vmatpush3.bf16.msra.mxu1 %v439_v20 }
  0x16   :  { %441 = vmatprep.subr.bf16.mxu1 %v479_v0  ;;  %461 = vmatpush3.bf16.msra.mxu0 %v460_v41 }
  0x17   :  { %462 = vmatprep.subr.bf16.mxu0 %v479_v0 }
  0x19   :  { %443 = vmatpush3.bf16.msra.mxu1 %v442_v23 }
  0x1a   :  { %444 = vmatprep.subr.bf16.mxu1 %v479_v0  ;;  %464 = vmatpush3.bf16.msra.mxu0 %v463_v44 }
  0x1b   :  { %465 = vmatprep.subr.bf16.mxu0 %v479_v0 }
  0x1d   :  { %446 = vmatpush3.bf16.msra.mxu1 %v445_v26 }
  0x1e   :  { %447 = vmatprep.subr.bf16.mxu1 %v479_v0  ;;  %467 = vmatpush3.bf16.msra.mxu0 %v466_v47 }
  0x1f   :  { %468 = vmatprep.subr.bf16.mxu0 %v479_v0 }
  0x21   :  { %449 = vmatpush3.bf16.msra.mxu1 %v448_v29 }
  0x22   :  { %470 = vmatpush3.bf16.msra.mxu0 %v469_v50 }
  0x23   :  { %471 = vmatprep.subr.bf16.mxu0 %v479_v0  ;;  %v308_v0 = vld [vmem:[%s665_s6] ss:$0 sm:$0xff] }
  0x26   :  { %473 = vmatpush3.bf16.msra.mxu0 %v472_v58 }
  0xda   :  { %v106_v52 = vpop.f32.mrb[0].mxu0 }
  0xdb   :  { %v107_v53 = vadd.f32 %v305_v51, %v106_v52  ;;  %v352_v54 = vpop.f32.mrb[1].mxu0 }
  0xdd   :  { %v110_v55 = vmax.f32 %v107_v53, 0.0 }
  0xdf   :  { %386 = vmatmul.mubr.f32.vlgmr.msra.gmra.mrb[0].mxu1 %v110_v55 }
 0x1b2   :  { %v200_v60 = vpop.f32.mrb[0].mxu1 }
 0x1b3   :  { %v201_v61 = vadd.f32 %v307_v59, %v200_v60  ;;  %v387_v62 = vpop.f32.mrb[1].mxu1 }
 0x1b5   :  { %v204_v63 = vmax.f32 %v201_v61, 0.0 }
 0x1b7   :  { %421 = vmatmul.mubr.f32.vlgmr.msra.gmra.mrb[2].mxu0 %v204_v63 }
 0x28a   :  { %v294_v1 = vpop.f32.mrb[2].mxu0 }
 0x28b   :  { %v295_v2 = vadd.f32 %v308_v0, %v294_v1  ;;  %v422_v3 = vpop.f32.mrb[3].mxu0 }
 0x28d   :  { %477 = vtanh.f32 %v295_v2 }
 0x297   :  { %v478_v4 = vpop.eup %477 }
 0x298   :  { %300 = vst.msk [vmem:[%s666_s7] sm:$0xff] %vm299_vm2, %v478_v4 }

</bundles_post_ra>
